<compile_context>
chip_gen: v7x
topology: tpu7x:2x2x1
jax: 0.10.0
libtpu: 0.0.40
codegen_flags: <defaults>
</compile_context>

<pallas_src>
import functools

import jax
import jax.numpy as jnp
from jax.experimental import pallas as pl
from jax.experimental.pallas import tpu as pltpu

OUTPUT_DIM = 8     # output_dim (== batch, required by the reference bmm)
INPUT_DIM = 32     # input_shape[1]
START_TEMP = 10.0
MIN_TEMP = 0.1
ALPHA = 0.99999


def _concrete_select_kernel(u_ref, logits_ref, x_ref, y_ref, *, inv_temp):
    # ---- Gumbel noise from uniform(eps, 1) samples ---------------------------
    gumbel = -jnp.log(-jnp.log(u_ref[...]))

    # ---- noisy logits / temperature ------------------------------------------
    noisy = (logits_ref[...] + gumbel) * jnp.float32(inv_temp)

    # ---- softmax over the feature axis (dim=-1) ------------------------------
    m = jnp.max(noisy, axis=-1, keepdims=True)
    e = jnp.exp(noisy - m)
    denom = jnp.sum(e, axis=-1, keepdims=True)
    samples = e * (1.0 / denom)            # (K, D)

    # ---- bmm((B,1,D),(B,D,1)) == per-row dot product --------------------------
    # Emit the result lane-dense as a single (1, K) row (one contiguous store,
    # no post-kernel reshape).
    y = jnp.sum(x_ref[...] * samples, axis=-1)   # (K,)
    y_ref[...] = y.reshape(1, -1)                # (1, K)


def concrete_select(x, logits, key, *, start_temp=START_TEMP,
                    min_temp=MIN_TEMP, alpha=ALPHA):
    """Training-mode ConcreteSelect forward. Returns y of shape (1, output_dim)."""
    k, d = logits.shape
    b, d2 = x.shape
    assert d == d2 and b == k, "reference bmm requires batch == output_dim"

    # temp = max(temp * alpha, min_temp): self.temp is a frozen parameter in the
    # reference, so this is pure compile-time scalar math -> bake 1/temp into the
    # kernel (no scalar operand / extra DMA).
    temp = max(start_temp * alpha, min_temp)

    # uniform_(eps, 1.0) equivalent, drawn in the wrapper (portable PRNG).
    eps = float(jnp.finfo(jnp.float32).eps)
    u = jax.random.uniform(key, (k, d), dtype=jnp.float32, minval=eps, maxval=1.0)

    kernel = functools.partial(_concrete_select_kernel, inv_temp=1.0 / temp)

    y = pl.pallas_call(
        kernel,
        out_shape=jax.ShapeDtypeStruct((1, k), jnp.float32),
        in_specs=[
            pl.BlockSpec(memory_space=pltpu.MemorySpace.VMEM),   # uniform (K, D)
            pl.BlockSpec(memory_space=pltpu.MemorySpace.VMEM),   # logits  (K, D)
            pl.BlockSpec(memory_space=pltpu.MemorySpace.VMEM),   # x       (K, D)
        ],
        out_specs=pl.BlockSpec(memory_space=pltpu.MemorySpace.VMEM),
    )(u, logits, x)

    # Already (1, output_dim) == y.view(-1, output_dim); no reshape needed.
    return y

# TODO(synk): eval-mode path (F.one_hot(torch.argmax(logits), D)) uses a flat
# argmax over a 2-D tensor and is shape-inconsistent in the reference; only the
# training-mode (Gumbel-softmax) path is implemented here.


if __name__ == "__main__":
    key = jax.random.PRNGKey(0)
    k_x, k_logits, k_noise = jax.random.split(key, 3)

    # Deterministic synthetic parameters / inputs (logits is uninitialized in
    # the PyTorch __init__, so we just draw it deterministically here).
    x = jax.random.normal(k_x, (OUTPUT_DIM, INPUT_DIM), dtype=jnp.float32)
    logits = 0.01 * jax.random.normal(k_logits, (OUTPUT_DIM, INPUT_DIM),
                                      dtype=jnp.float32)

    y = concrete_select(x, logits, k_noise)
    jax.block_until_ready(y)
    assert y.shape == (1, OUTPUT_DIM) and y.dtype == jnp.float32
    assert bool(jnp.all(jnp.isfinite(y)))
    print("KERNEL_OK")
</pallas_src>

<mosaic_0001>
module attributes {stable_mosaic.version = 11 : i64} {
  func.func @_concrete_select_kernel(%arg0: memref<8x32xf32, #tpu.memory_space<vmem>>, %arg1: memref<8x32xf32, #tpu.memory_space<vmem>>, %arg2: memref<8x32xf32, #tpu.memory_space<vmem>>, %arg3: memref<1x8xf32, #tpu.memory_space<vmem>>) attributes {dimension_semantics = [], scalar_prefetch = 0 : i64, scratch_operands = 0 : i64, tpu.core_type = #tpu.core_type<tc>} {
    %c0 = arith.constant 0 : index
    %c0_0 = arith.constant 0 : index
    %0 = vector.load %arg0[%c0, %c0_0] : memref<8x32xf32, #tpu.memory_space<vmem>>, vector<8x32xf32>
    %1 = math.log %0 : vector<8x32xf32>
    %cst = arith.constant 0.000000e+00 : f32
    %2 = vector.broadcast %cst : f32 to vector<8x32xf32>
    %3 = arith.subf %2, %1 : vector<8x32xf32>
    %4 = math.log %3 : vector<8x32xf32>
    %cst_1 = arith.constant 0.000000e+00 : f32
    %5 = vector.broadcast %cst_1 : f32 to vector<8x32xf32>
    %6 = arith.subf %5, %4 : vector<8x32xf32>
    %c0_2 = arith.constant 0 : index
    %c0_3 = arith.constant 0 : index
    %7 = vector.load %arg1[%c0_2, %c0_3] : memref<8x32xf32, #tpu.memory_space<vmem>>, vector<8x32xf32>
    %8 = arith.addf %7, %6 : vector<8x32xf32>
    %cst_4 = arith.constant 1.000010e-01 : f32
    %9 = vector.broadcast %cst_4 : f32 to vector<8x32xf32>
    %10 = arith.mulf %8, %9 : vector<8x32xf32>
    %cst_5 = arith.constant dense<0xFF800000> : vector<8xf32>
    %11 = vector.multi_reduction <maximumf>, %10, %cst_5 [1] : vector<8x32xf32> to vector<8xf32>
    %12 = vector.shape_cast %11 : vector<8xf32> to vector<8x1xf32>
    %13 = vector.broadcast %12 : vector<8x1xf32> to vector<8x32xf32>
    %14 = arith.subf %10, %13 : vector<8x32xf32>
    %15 = math.exp %14 : vector<8x32xf32>
    %cst_6 = arith.constant dense<0.000000e+00> : vector<8xf32>
    %16 = vector.multi_reduction <add>, %15, %cst_6 [1] : vector<8x32xf32> to vector<8xf32>
    %17 = vector.shape_cast %16 : vector<8xf32> to vector<8x1xf32>
    %cst_7 = arith.constant 1.000000e+00 : f32
    %18 = vector.broadcast %cst_7 : f32 to vector<8x1xf32>
    %19 = arith.divf %18, %17 : vector<8x1xf32>
    %20 = vector.broadcast %19 : vector<8x1xf32> to vector<8x32xf32>
    %21 = arith.mulf %15, %20 : vector<8x32xf32>
    %c0_8 = arith.constant 0 : index
    %c0_9 = arith.constant 0 : index
    %22 = vector.load %arg2[%c0_8, %c0_9] : memref<8x32xf32, #tpu.memory_space<vmem>>, vector<8x32xf32>
    %23 = arith.mulf %22, %21 : vector<8x32xf32>
    %cst_10 = arith.constant dense<0.000000e+00> : vector<8xf32>
    %24 = vector.multi_reduction <add>, %23, %cst_10 [1] : vector<8x32xf32> to vector<8xf32>
    %25 = vector.shape_cast %24 : vector<8xf32> to vector<1x8xf32>
    %c0_11 = arith.constant 0 : index
    %c0_12 = arith.constant 0 : index
    %26 = vector.load %arg3[%c0_11, %c0_12] : memref<1x8xf32, #tpu.memory_space<vmem>>, vector<1x8xf32>
    tpu.vector_store %arg3[%c0_11, %c0_12], %25 {strides = array<i32>} : memref<1x8xf32, #tpu.memory_space<vmem>>, vector<1x8xf32>,
    return
  }
}

</mosaic_0001>

<bundles_post_ra>
// kernel: tpu_custom_call.1
= control target key start
LH: loop header
LB: loop body
LE: loop exit
PB: predicated region body
PF: predicated region fallthrough
CT: control target
= control target key end

     0   :  { %8 = vsyncpa [#allocation3], 0  ;;  %s285_s0 = inlined_call_operand.hbm [shape: f32[8,32], index: 0, kind: input, shape index: {}]   ;;  %s286_s1 = inlined_call_operand.hbm [shape: f32[8,32], index: 1, kind: input, shape index: {}]   ;;  %s287_s2 = inlined_call_operand.hbm [shape: f32[8,32], index: 2, kind: input, shape index: {}]   ;;  %s288_s3 = inlined_call_operand.hbm [shape: f32[1,8], index: 3, kind: output, shape index: {}]  }
   0x1   :  { %9 = vsyncpa [#allocation6], 0 }
   0x2   :  { %10 = vsyncpa [#allocation4], 0  ;;  %s210_s12 = smov [#allocation5]   ;;  %s211_s14 = smov [#allocation2]  }
   0x3   :  { %s27_s13 = sshll.u32 %s210_s12, 4  ;;  %s17_s15 = sshll.u32 %s211_s14, 4  ;;  %s28_s13 = int_to_ptr.vmem [resolvable:$true] %s27_s13  ;;  %s18_s15 = int_to_ptr.vmem [resolvable:$true] %s17_s15 }
   0x4   :  { %s116_s18 = scalar_lea.hbm %s286_s1, 128 }
   0x5   :  { %p117_p0 = scmp.ne.s32.totalorder %s286_s1, %s116_s18  ;;  %p120_p1 = scmp.lt.u32.totalorder %s116_s18, %s286_s1 }
   0x7   :  { %p122_p2 = pnand %p120_p1, %p117_p0 }
   0x9   :  { %125 = shalt.err (!%p122_p2)
}
   0xa   :  { %s126_s23 = scalar_lea.vmem %s28_s13, 128  ;;  %p131_p4 = scmp.lt.s32.totalorder %s28_s13, %s28_s13 }
   0xb   :  { %p127_p3 = scmp.ne.s32.totalorder %s28_s13, %s126_s23  ;;  %p132_p5 = scmp.lt.s32.totalorder %s126_s23, %s126_s23 }
   0xd   :  { %p133_p6 = por %p132_p5, %p131_p4 }
   0xf   :  { %p134_p7 = pnand %p133_p6, %p127_p3 }
  0x11   :  { %137 = shalt.err (!%p134_p7)
}
  0x12   :  { %30 = dma.hbm_to_vmem [thread:$0]  %s286_s1, 128, %s28_s13, [#allocation6]  }
  0x13   :  { %s138_s28 = scalar_lea.hbm %s285_s0, 128 }
  0x14   :  { %p139_p8 = scmp.ne.s32.totalorder %s285_s0, %s138_s28  ;;  %p142_p9 = scmp.lt.u32.totalorder %s138_s28, %s285_s0 }
  0x16   :  { %p144_p10 = pnand %p142_p9, %p139_p8 }
  0x18   :  { %147 = shalt.err (!%p144_p10)
}
  0x19   :  { %s148_s6 = scalar_lea.vmem %s18_s15, 128  ;;  %p153_p12 = scmp.lt.s32.totalorder %s18_s15, %s18_s15 }
  0x1a   :  { %p149_p11 = scmp.ne.s32.totalorder %s18_s15, %s148_s6  ;;  %p154_p13 = scmp.lt.s32.totalorder %s148_s6, %s148_s6 }
  0x1c   :  { %p155_p0 = por %p154_p13, %p153_p12 }
  0x1e   :  { %p156_p1 = pnand %p155_p0, %p149_p11 }
  0x20   :  { %159 = shalt.err (!%p156_p1)
}
  0x21   :  { %20 = dma.hbm_to_vmem [thread:$0]  %s285_s0, 128, %s18_s15, [#allocation3]  }
  0x22   :  { %s212_s8 = smov [#allocation7]   ;;  %s160_s12 = scalar_lea.hbm %s287_s2, 128 }
  0x23   :  { %s37_s9 = sshll.u32 %s212_s8, 4  ;;  %p161_p2 = scmp.ne.s32.totalorder %s287_s2, %s160_s12  ;;  %s38_s9 = int_to_ptr.vmem [resolvable:$true] %s37_s9 }
  0x24   :  { %p164_p3 = scmp.lt.u32.totalorder %s160_s12, %s287_s2 }
  0x26   :  { %p166_p4 = pnand %p164_p3, %p161_p2 }
  0x28   :  { %169 = shalt.err (!%p166_p4)
}
  0x29   :  { %s170_s18 = scalar_lea.vmem %s38_s9, 128  ;;  %p175_p6 = scmp.lt.s32.totalorder %s38_s9, %s38_s9 }
  0x2a   :  { %p171_p5 = scmp.ne.s32.totalorder %s38_s9, %s170_s18  ;;  %p176_p7 = scmp.lt.s32.totalorder %s170_s18, %s170_s18 }
  0x2c   :  { %p177_p8 = por %p176_p7, %p175_p6 }
  0x2e   :  { %p178_p9 = pnand %p177_p8, %p171_p5 }
  0x30   :  { %181 = shalt.err (!%p178_p9)
}
  0x31   :  { %40 = dma.hbm_to_vmem [thread:$0]  %s287_s2, 128, %s38_s9, [#allocation6]  }
  0x32   :  { %204 = dma.done.wait [#allocation3], 128  }
  0x33   :  { %205 = vsyncadd [#allocation3], 4294967168 }
  0x34   :  { %206 = dma.done.wait [#allocation6], 256  }
  0x35   :  { %207 = vsyncadd [#allocation6], 4294967040  ;;  %v50_v0 = vld [vmem:[#allocation2] sm:$0xff]  ;;  %v57_v6 = vld [vmem:[#allocation5] sm:$0xff]  ;;  %vm60_vm0 = vcmask 261120   ;;  %v79_v22 = vlaneseq  ;;  %s213_s2 = smov [#allocation8]  }
  0x36   :  { %108 = vlog2.f32 %v50_v0  ;;  %v73_v18 = vld [vmem:[#allocation7] sm:$0xff]  ;;  %s94_s19 = sshll.u32 %s213_s2, 4  ;;  %vm86_vm1 = vcmask 57344   ;;  %s95_s19 = int_to_ptr.vmem [resolvable:$true] %s94_s19 }
  0x37   :  { %v80_v23 = vand.u32 127, %v79_v22  ;;  %v82_v24 = vshrl.u32 %v79_v22, 7  ;;  %s182_s20 = scalar_lea.vmem %s95_s19, 16  ;;  %s186_s21 = scalar_lea.vmem %s95_s19, 32 }
  0x38   :  { %p183_p10 = scmp.ne.s32.totalorder %s95_s19, %s182_s20  ;;  %p187_p11 = scmp.lt.s32.totalorder %s95_s19, %s95_s19 }
  0x39   :  { %v83_v25 = vsub.s32 %v80_v23, %v82_v24  ;;  %p188_p12 = scmp.lt.s32.totalorder %s186_s21, %s182_s20 }
  0x3b   :  { %p189_p13 = por %p188_p12, %p187_p11 }
  0x3d   :  { %p190_p0 = pnand %p189_p13, %p183_p10 }
  0x40   :  { %v109_v1 = vpop.eup %108 }
  0x41   :  { %v52_v2 = vmul.f32 0.6931472, %v109_v1 }
  0x43   :  { %v53_v3 = vsub.f32 0.0, %v52_v2 }
  0x45   :  { %110 = vlog2.f32 %v53_v3 }
  0x4f   :  { %v111_v4 = vpop.eup %110 }
  0x50   :  { %v55_v5 = vmul.f32 0.6931472, %v111_v4 }
  0x52   :  { %v56_v7 = vsub.f32 0.0, %v55_v5 }
  0x54   :  { %v58_v8 = vadd.f32 %v57_v6, %v56_v7 }
  0x56   :  { %v59_v9 = vmul.f32 0.100001, %v58_v8 }
  0x58   :  { %v61_v10 = vsel %vm60_vm0, %v59_v9, -inf }
  0x59   :  { %62 = vmax.xlane.f32.xlu0 %v61_v10 }
  0xe6   :  { %v63_v11 = vpop.xlane.xlu0 %62 }
  0xe7   :  { %v64_v12 = vsub.f32 %v59_v9, %v63_v11 }
  0xe9   :  { %v65_v13 = vmul.f32 1.442695, %v64_v12 }
  0xeb   :  { %112 = vpow2.f32 %v65_v13 }
  0xf5   :  { %v113_v14 = vpop.eup %112 }
  0xf6   :  { %v67_v15 = vsel %vm60_vm0, %v113_v14, 0.0 }
  0xf7   :  { %68 = vadd.xlane.f32.xlu0 %v67_v15 }
 0x184   :  { %v69_v16 = vpop.xlane.xlu0 %68 }
 0x185   :  { %114 = vrcp.f32 %v69_v16 }
 0x18f   :  { %v115_v17 = vpop.eup %114 }
 0x190   :  { %v72_v19 = vmul.f32 %v115_v17, %v113_v14 }
 0x192   :  { %v74_v20 = vmul.f32 %v73_v18, %v72_v19 }
 0x194   :  { %v75_v21 = vsel %vm60_vm0, %v74_v20, 0.0 }
 0x195   :  { %76 = vadd.xlane.f32.xlu1 %v75_v21 }
 0x222   :  { %v77_v26 = vpop.xlane.xlu1 %76 }
 0x223   :  { %v84_v27 = vrot.slane %v77_v26, %v83_v25 }
 0x225   :  { %87 = vst.msk [vmem:[#allocation8] sm:$0x1] %vm86_vm1, %v84_v27 }
 0x226   :  { %193 = shalt.err (!%p190_p0)
}
 0x227   :  { %s194_s24 = scalar_lea.hbm %s288_s3, 16 }
 0x228   :  { %p195_p1 = scmp.ne.s32.totalorder %s288_s3, %s194_s24  ;;  %p198_p2 = scmp.lt.u32.totalorder %s194_s24, %s288_s3 }
 0x22a   :  { %p200_p3 = pnand %p198_p2, %p195_p1 }
 0x22c   :  { %203 = shalt.err (!%p200_p3)
}
 0x22d   :  { %97 = dma.vmem_to_hbm [thread:$0]  %s95_s19, 16, %s288_s3, [#allocation4]  }
 0x22e   :  { %208 = dma.done.wait [#allocation4], 16  }
 0x22f   :  { %209 = vsyncadd [#allocation4], 4294967280 }
 0x230   :  { %101 = vsyncpa [#allocation3], 1 }
 0x231   :  { %102 = vsyncpa [#allocation6], 1 }
 0x232   :  { %103 = vsyncpa [#allocation4], 1 }

</bundles_post_ra>
